<compile_context>
chip_gen: v6e
topology: v6e:2x2x1
jax: 0.10.0
libtpu: 0.0.40
codegen_flags: <defaults>
</compile_context>

<pallas_src>
import functools

import jax
import jax.numpy as jnp
from jax.experimental import pallas as pl
from jax.experimental.pallas import tpu as pltpu


def _round_up(x, m):
    return ((x + m - 1) // m) * m


def _patch_embed_kernel(x_ref, w_ref, b_ref, o_ref):
    # x_ref: (TM, K')  patch tile (compute dtype, e.g. bf16)
    # w_ref: (K', E')  projection weight (compute dtype), resident across grid
    # b_ref: (1,  E')  bias in f32
    # o_ref: (TM, E')  output tile (output dtype)
    acc = jnp.dot(x_ref[...], w_ref[...], preferred_element_type=jnp.float32)
    o_ref[...] = (acc + b_ref[...]).astype(o_ref.dtype)


def _vmem_capacity_bytes():
    """Per-core VMEM capacity; conservative (v7x-sized) fallback if query fails."""
    try:
        return int(pltpu.get_tpu_info().vmem_capacity_bytes)
    except Exception:
        return 64 << 20


def _working_set_bytes(tm, K, E_pad, in_bytes, out_bytes):
    return (2 * tm * K * in_bytes            # double-buffered activation tile
            + 2 * tm * E_pad * out_bytes     # double-buffered output tile
            + 2 * tm * E_pad * 4             # f32 accumulator + epilogue temps
            + K * E_pad * in_bytes           # weight (single-buffered resident)
            + 2 * E_pad * 4)                 # bias


def _choose_tm(M, K, E_pad, in_bytes, out_bytes, budget_bytes,
               tm_max=1024, mxu_align=256, min_grid_steps=4):
    """Largest MXU-aligned M-tile whose working set fits the VMEM budget.

    Also caps tm so the grid keeps >= min_grid_steps steps when M is large
    enough, so both TensorCores stay busy on v7x under 'parallel' semantics
    (near-free on single-TC v5e/v6e)."""
    tm = min(tm_max, _round_up(M, 8))
    if M >= mxu_align * min_grid_steps:
        tm = min(tm, _round_up(pl.cdiv(M, min_grid_steps), mxu_align))
    tm = _round_up(tm, mxu_align) if tm >= mxu_align else _round_up(tm, 8)
    while tm > 8 and _working_set_bytes(tm, K, E_pad, in_bytes, out_bytes) > budget_bytes:
        if tm > mxu_align:
            tm = _round_up(tm // 2, mxu_align)
        else:
            tm = max(8, _round_up(tm // 2, 8))
    return tm


def patch_embed(x, weight, bias, *, patch_size, compute_dtype=jnp.bfloat16,
                out_dtype=None, tm_max=1024):
    """
    x:      (B, C, H, W)       (PyTorch NCHW)
    weight: (E, C, p, p)       (PyTorch Conv2d weight layout)
    bias:   (E,)
    returns (B, n_patches, E)  == Conv2d(stride=p)(x).flatten(2).transpose(1, 2)

    Set out_dtype=jnp.bfloat16 when the downstream consumer accepts bf16 to
    halve the output HBM write.  Set compute_dtype=jnp.float32 for strict
    f32 Conv2d parity (slower MXU path).
    """
    B, C, H, W = x.shape
    E = weight.shape[0]
    p = patch_size
    assert H % p == 0 and W % p == 0, "img_size must be divisible by patch_size"
    hp, wp = H // p, W // p
    n_patches = hp * wp
    K = C * p * p
    M = B * n_patches
    out_dtype = x.dtype if out_dtype is None else out_dtype

    in_bytes = jnp.dtype(compute_dtype).itemsize
    out_bytes = jnp.dtype(out_dtype).itemsize

    # Lane-dense contraction / embedding dims (zero padding is exact math).
    K_pad = _round_up(K, 128)
    E_pad = _round_up(E, 128)

    # --- glue: patchify (reshape/transpose only).  Cast to the compute dtype
    # FIRST so this standalone pass writes 2 B/elem (f32 read, bf16 write).
    # TODO(synk): evaluate allow_input_fusion=[True, False, False] to fold this
    # producer into the Pallas input DMA and drop the extra HBM pass entirely.
    xp = x.astype(compute_dtype).reshape(B, C, hp, p, wp, p)
    xp = jnp.transpose(xp, (0, 2, 4, 1, 3, 5)).reshape(M, K)
    if K_pad != K:
        xp = jnp.pad(xp, ((0, 0), (0, K_pad - K)))

    # weight (E, C, p, p) -> (K, E); flatten order (C, p, p) matches Conv2d.
    w = weight.reshape(E, K).astype(compute_dtype).T
    if K_pad != K or E_pad != E:
        w = jnp.pad(w, ((0, K_pad - K), (0, E_pad - E)))
    b = bias.astype(jnp.float32).reshape(1, E)
    if E_pad != E:
        b = jnp.pad(b, ((0, 0), (0, E_pad - E)))

    # Generation-aware VMEM sizing: v7x has 64 MiB/TC, v5e/v6e have 128 MiB.
    vmem_cap = _vmem_capacity_bytes()
    budget = int(0.40 * vmem_cap)            # ~25 MiB on v7x, ~51 MiB on v5e/v6e
    tm = _choose_tm(M, K_pad, E_pad, in_bytes, out_bytes, budget, tm_max=tm_max)

    # cdiv grid: no M padding, tail block is clamped by Pallas (masked stores),
    # so there is no post-kernel slice/copy along M.
    grid = (pl.cdiv(M, tm),)

    need = _working_set_bytes(tm, K_pad, E_pad, in_bytes, out_bytes)
    vmem_limit = int(min(max(2 * need, 32 << 20), int(0.80 * vmem_cap)))
    vmem_limit = int(min(max(vmem_limit, need + (4 << 20)), int(0.90 * vmem_cap)))

    cost = pl.CostEstimate(
        flops=2 * M * K_pad * E_pad,
        transcendentals=0,
        bytes_accessed=int(M * K_pad * in_bytes + K_pad * E_pad * in_bytes
                           + E_pad * 4 + M * E_pad * out_bytes),
    )

    out = pl.pallas_call(
        _patch_embed_kernel,
        out_shape=jax.ShapeDtypeStruct((M, E_pad), out_dtype),
        grid=grid,
        in_specs=[
            # activation tiles: pipelined / double-buffered across the grid
            pl.BlockSpec((tm, K_pad), lambda i: (i, 0)),
            # weight + bias: constant block index -> single-buffered residents
            pl.BlockSpec((K_pad, E_pad), lambda i: (0, 0),
                         pipeline_mode=pl.Buffered(1)),
            pl.BlockSpec((1, E_pad), lambda i: (0, 0),
                         pipeline_mode=pl.Buffered(1)),
        ],
        out_specs=pl.BlockSpec((tm, E_pad), lambda i: (i, 0)),
        compiler_params=pltpu.CompilerParams(
            dimension_semantics=("parallel",),   # shard M tiles across TCs (v7x)
            vmem_limit_bytes=vmem_limit,
        ),
        cost_estimate=cost,
    )(xp, w, b)

    if E_pad != E:
        out = out[:, :E]          # no-op for ViT-B/L/H where E is 128-aligned
    return out.reshape(B, n_patches, E)


if __name__ == "__main__":
    # Small, module-consistent shapes.
    B, C, IMG, PATCH, EMBED = 2, 4, 16, 4, 32

    key = jax.random.PRNGKey(0)
    kx, kw, kb = jax.random.split(key, 3)

    x = jax.random.normal(kx, (B, C, IMG, IMG), dtype=jnp.float32)
    weight = jax.random.normal(kw, (EMBED, C, PATCH, PATCH), dtype=jnp.float32) * 0.02
    bias = jax.random.normal(kb, (EMBED,), dtype=jnp.float32) * 0.02

    fn = jax.jit(functools.partial(patch_embed, patch_size=PATCH))
    out = jax.block_until_ready(fn(x, weight, bias))

    hp = IMG // PATCH
    n_patches = hp * hp
    K = C * PATCH * PATCH
    assert out.shape == (B, n_patches, EMBED), out.shape

    # Reference 1: same math with the same bf16 input casts (tight tolerance).
    xp_ref = x.reshape(B, C, hp, PATCH, hp, PATCH)
    xp_ref = jnp.transpose(xp_ref, (0, 2, 4, 1, 3, 5)).reshape(B * n_patches, K)
    ref_bf = jnp.dot(xp_ref.astype(jnp.bfloat16),
                     weight.reshape(EMBED, K).T.astype(jnp.bfloat16),
                     preferred_element_type=jnp.float32) + bias.reshape(1, EMBED)
    ref_bf = ref_bf.astype(x.dtype).reshape(B, n_patches, EMBED)
    assert jnp.allclose(out, ref_bf, atol=1e-3, rtol=1e-3)

    # Reference 2: full-precision Conv2d semantics check (bf16-level tolerance).
    ref = jax.lax.conv_general_dilated(
        x, weight, window_strides=(PATCH, PATCH), padding="VALID",
        dimension_numbers=("NCHW", "OIHW", "NCHW"),
    ) + bias.reshape(1, EMBED, 1, 1)
    ref = ref.reshape(B, EMBED, -1).transpose(0, 2, 1)
    assert jnp.allclose(out, ref, atol=3e-2, rtol=3e-2)

    print("KERNEL_OK")
</pallas_src>

<mosaic_0001>
module attributes {stable_mosaic.version = 11 : i64} {
  func.func @_patch_embed_kernel(%arg0: i32, %arg1: memref<32x128xbf16, #tpu.memory_space<vmem>>, %arg2: memref<128x128xbf16, #tpu.memory_space<vmem>>, %arg3: memref<1x128xf32, #tpu.memory_space<vmem>>, %arg4: memref<32x128xf32, #tpu.memory_space<vmem>>) attributes {dimension_semantics = [#tpu.dimension_semantics<parallel>], iteration_bounds = array<i64: 1>, scalar_prefetch = 0 : i64, scratch_operands = 0 : i64, tpu.core_type = #tpu.core_type<tc>, window_params = [{transform_indices = @transform_0, window_bounds = array<i64: 32, 128>}, {pipeline_mode = #tpu.pipeline_mode<synchronous>, transform_indices = @transform_1, window_bounds = array<i64: 128, 128>}, {pipeline_mode = #tpu.pipeline_mode<synchronous>, transform_indices = @transform_2, window_bounds = array<i64: 1, 128>}, {transform_indices = @transform_3, window_bounds = array<i64: 32, 128>}]} {
    %c0 = arith.constant 0 : index
    %c0_0 = arith.constant 0 : index
    %0 = vector.load %arg1[%c0, %c0_0] : memref<32x128xbf16, #tpu.memory_space<vmem>>, vector<32x128xbf16>
    %c0_1 = arith.constant 0 : index
    %c0_2 = arith.constant 0 : index
    %1 = vector.load %arg2[%c0_1, %c0_2] : memref<128x128xbf16, #tpu.memory_space<vmem>>, vector<128x128xbf16>
    %cst = arith.constant dense<0.000000e+00> : vector<32x128xf32>
    %2 = tpu.matmul %0, %1, %cst {dimension_numbers = #tpu.dot_dimension_numbers<[1], [0], [0], [1], [0, 0, 1, 1], [], []>} : vector<32x128xbf16>, vector<128x128xbf16>, vector<32x128xf32> -> vector<32x128xf32>
    %c0_3 = arith.constant 0 : index
    %c0_4 = arith.constant 0 : index
    %3 = vector.load %arg3[%c0_3, %c0_4] : memref<1x128xf32, #tpu.memory_space<vmem>>, vector<1x128xf32>
    %4 = vector.broadcast %3 : vector<1x128xf32> to vector<32x128xf32>
    %5 = arith.addf %2, %4 : vector<32x128xf32>
    %c0_5 = arith.constant 0 : index
    %c0_6 = arith.constant 0 : index
    %6 = vector.load %arg4[%c0_5, %c0_6] : memref<32x128xf32, #tpu.memory_space<vmem>>, vector<32x128xf32>
    tpu.vector_store %arg4[%c0_5, %c0_6], %5 {strides = array<i32>} : memref<32x128xf32, #tpu.memory_space<vmem>>, vector<32x128xf32>,
    return
  }
  func.func @transform_0(%arg0: i32) -> (i32, i32) {
    %c0_i32 = arith.constant 0 : i32
    %c0_i32_0 = arith.constant 0 : i32
    return %arg0, %c0_i32 : i32, i32
  }
  func.func @transform_1(%arg0: i32) -> (i32, i32) {
    %c0_i32 = arith.constant 0 : i32
    %c0_i32_0 = arith.constant 0 : i32
    %c0_i32_1 = arith.constant 0 : i32
    return %c0_i32, %c0_i32_0 : i32, i32
  }
  func.func @transform_2(%arg0: i32) -> (i32, i32) {
    %c0_i32 = arith.constant 0 : i32
    %c0_i32_0 = arith.constant 0 : i32
    %c0_i32_1 = arith.constant 0 : i32
    return %c0_i32, %c0_i32_0 : i32, i32
  }
  func.func @transform_3(%arg0: i32) -> (i32, i32) {
    %c0_i32 = arith.constant 0 : i32
    %c0_i32_0 = arith.constant 0 : i32
    return %arg0, %c0_i32 : i32, i32
  }
}

</mosaic_0001>

<bundles_post_ra>
// kernel: patch_embed.1
= control target key start
LH: loop header
LB: loop body
LE: loop exit
PB: predicated region body
PF: predicated region fallthrough
CT: control target
= control target key end

     0   :  { %s307_s0 = inlined_call_operand.vmem [shape: bf16[32,128], index: 0, kind: input, shape index: {}]   ;;  %s308_s1 = inlined_call_operand.vmem [shape: bf16[128,128], index: 1, kind: input, shape index: {}]   ;;  %s309_s2 = inlined_call_operand.vmem [shape: f32[1,128], index: 2, kind: input, shape index: {}]   ;;  %s310_s3 = inlined_call_operand.hbm [shape: f32[32,128], index: 3, kind: output, shape index: {}]  }
   0x1   :  { %v216_v0 = vld [vmem:[%s308_s1 + $0x38] sm:$0xff]   ;;  %v217_v1 = vld [vmem:[%s308_s1 + $0x30] sm:$0xff]   ;;  %v218_v2 = vld [vmem:[%s308_s1 + $0x28] sm:$0xff]  }
   0x2   :  { %193 = vmatprep.subr.bf16.mxu0 %v216_v0  ;;  %v219_v3 = vld [vmem:[%s308_s1 + $0x20] sm:$0xff]  }
   0x3   :  { %194 = vmatpush3.bf16.msra.mxu0 %v216_v0  ;;  %v224_v4 = vld [vmem:[%s307_s0] sm:$0xff]  }
   0x4   :  { %195 = vmatprep.subr.bf16.mxu0 %v217_v1  ;;  %209 = vmatprep.mubr.bf16.mxu0 %v224_v4 }
   0x7   :  { %196 = vmatpush3.bf16.msra.mxu0 %v217_v1 }
   0x8   :  { %197 = vmatprep.subr.bf16.mxu0 %v218_v2 }
   0x9   :  { %8 = vsyncpa [#allocation3], 0  ;;  %v220_v5 = vld [vmem:[%s308_s1 + $0x18] sm:$0xff]   ;;  %v221_v6 = vld [vmem:[%s308_s1 + $0x10] sm:$0xff]   ;;  %s248_s7 = smov [#allocation2]  }
   0xa   :  { %v222_v7 = vld [vmem:[%s308_s1 + $0x8] sm:$0xff]   ;;  %v223_v8 = vld [vmem:[%s308_s1] sm:$0xff]   ;;  %s161_s8 = sshll.u32 %s248_s7, 4  ;;  %s162_s8 = int_to_ptr.vmem [resolvable:$true] %s161_s8 }
   0xb   :  { %198 = vmatpush3.bf16.msra.mxu0 %v218_v2  ;;  %v225_v9 = vld [vmem:[%s307_s0 + $0x8] sm:$0xff]   ;;  %v172_v10 = vld [vmem:[%s309_s2] ss:$0 sm:$0xff]  ;;  %s226_s0 = scalar_lea.vmem %s162_s8, 512  ;;  %p231_p1 = scmp.lt.s32.totalorder %s162_s8, %s162_s8 }
   0xc   :  { %199 = vmatprep.subr.bf16.mxu0 %v219_v3  ;;  %p227_p0 = scmp.ne.s32.totalorder %s162_s8, %s226_s0  ;;  %p232_p2 = scmp.lt.s32.totalorder %s226_s0, %s226_s0 }
   0xe   :  { %p233_p3 = por %p232_p2, %p231_p1 }
   0xf   :  { %200 = vmatpush3.bf16.msra.mxu0 %v219_v3 }
  0x10   :  { %201 = vmatprep.subr.bf16.mxu0 %v220_v5  ;;  %p234_p4 = pnand %p233_p3, %p227_p0 }
  0x13   :  { %202 = vmatpush3.bf16.msra.mxu0 %v220_v5 }
  0x14   :  { %203 = vmatprep.subr.bf16.mxu0 %v221_v6 }
  0x17   :  { %204 = vmatpush3.bf16.msra.mxu0 %v221_v6 }
  0x18   :  { %205 = vmatprep.subr.bf16.mxu0 %v222_v7 }
  0x1b   :  { %206 = vmatpush3.bf16.msra.mxu0 %v222_v7 }
  0x1c   :  { %207 = vmatprep.subr.bf16.mxu0 %v223_v8 }
  0x1f   :  { %208 = vmatpush3.bf16.msra.mxu0 %v223_v8 }
  0x22   :  { %210 = vmatmul.mubr.bf16.vlgmr.msra.gmra.mxu0 %v225_v9 }
  0xe2   :  { %v211_v11 = vpop.f32.mrf.mxu0 }
  0xe3   :  { %v146_v12 = vadd.f32 %v211_v11, %v172_v10 }
  0xe4   :  { %v137_v13 = vpop.f32.mrf.mxu0 }
  0xe5   :  { %154 = vst [vmem:[#allocation2 + $0x10] sm:$0xff] %v146_v12  ;;  %v138_v14 = vadd.f32 %v172_v10, %v137_v13 }
  0xe6   :  { %v212_v15 = vpop.f32.mrf.mxu0 }
  0xe7   :  { %152 = vst [vmem:[#allocation2] sm:$0xff] %v138_v14  ;;  %v149_v16 = vadd.f32 %v212_v15, %v172_v10 }
  0xe8   :  { %v140_v17 = vpop.f32.mrf.mxu0 }
  0xe9   :  { %155 = vst [vmem:[#allocation2 + $0x18] sm:$0xff] %v149_v16  ;;  %v141_v18 = vadd.f32 %v172_v10, %v140_v17 }
  0xeb   :  { %153 = vst [vmem:[#allocation2 + $0x8] sm:$0xff] %v141_v18 }
  0xec   :  { %237 = shalt.err (!%p234_p4)
}
  0xed   :  { %s249_s1 = smov 128   ;;  %s250_s2 = smov 8  }
  0xee   :  { %167 = dma.vmem_to_hbm [thread:$0]  %s162_s8, 512, %s310_s3, [#allocation3], %s249_s1, %s249_s1, %s250_s2  }
  0xef   :  { %246 = dma.done.wait [#allocation3], 512  }
  0xf0   :  { %247 = vsyncadd [#allocation3], 4294966784 }
  0xf1   :  { %171 = vsyncpa [#allocation3], 1 }

</bundles_post_ra>
